<compile_context>
chip_gen: v7x
topology: tpu7x:2x2x1
jax: 0.10.0
libtpu: 0.0.40
codegen_flags: <defaults>
</compile_context>

<pallas_src>
import functools

import jax
import jax.numpy as jnp
from jax.experimental import pallas as pl
from jax.experimental.pallas import tpu as pltpu

_LANE = 128        # TPU lane width (last-dim padding target)
_ROW_ALIGN = 16    # batch-tile row alignment (bf16 sublane tile is (16, 128))
_TB_MAX = 1024     # max batch rows per grid step (bf16 1024-feat tile = 2 MiB)
_PAD_BIAS = 1e30   # added to padded class lanes of ||c||^2 -> ~-inf in softmax


def _round_up(n, m):
    return ((n + m - 1) // m) * m


def _cdiv(a, b):
    return -(-a // b)


def _choose_batch_tile(B):
    """Batch tile: >=2 grid steps for non-trivial B (v7x dual-TC), <=_TB_MAX rows,
    rounded to _ROW_ALIGN so batch padding stays small."""
    if B >= 16:
        n_steps = max(2, _cdiv(B, _TB_MAX))
    else:
        n_steps = 1
    tb = _round_up(_cdiv(B, n_steps), _ROW_ALIGN)
    bp = _round_up(B, tb)
    return tb, bp


def _netxd_kernel(x_ref, w_ref, b_ref, c_ref, csq_ref,
                  x1_ref, nd_ref, out_ref, *, scale):
    # fc: x1 = x @ W + b.  x/W are bf16 in VMEM; MXU accumulates in f32.
    x1 = jnp.dot(x_ref[...], w_ref[...],
                 preferred_element_type=jnp.float32) + b_ref[...]
    x1_ref[...] = x1.astype(x1_ref.dtype)

    # dce_loss distance: -(||x1||^2 + ||c||^2 - 2 * x1 @ c).
    # centers are stored bf16 (HBM/VMEM bytes) but the tiny second matmul is
    # done in f32 so the distance math is exact given x1.
    feat_sq = jnp.sum(x1 * x1, axis=1, keepdims=True)                  # (TB, 1)
    fic = 2.0 * jnp.dot(x1, c_ref[...].astype(jnp.float32),
                        preferred_element_type=jnp.float32)            # (TB, Cp)
    # csq padded class lanes carry +1e30 -> neg_dist padded lanes ~ -1e30, which
    # makes them vanish in the softmax below with zero per-tile mask work.
    neg_dist = fic - feat_sq - csq_ref[...]
    nd_ref[...] = neg_dist.astype(nd_ref.dtype)

    # output = log_softmax(scale * neg_dist, axis=1)
    z = scale * neg_dist
    m = jnp.max(z, axis=1, keepdims=True)
    lse = jnp.log(jnp.sum(jnp.exp(z - m), axis=1, keepdims=True)) + m
    out_ref[...] = (z - lse).astype(out_ref.dtype)


def netxd_forward(x_feat, fc_w, fc_b, centers, scale=2.0):
    """Pallas implementation of NetXd.forward on pre-extracted features.

    Returns (x1, centers, neg_dist, output) matching the PyTorch module.
    """
    B, fc_dim = x_feat.shape
    hidden = fc_w.shape[1]
    n_classes = centers.shape[1]

    hp = _round_up(hidden, _LANE)        # padded HIDDEN (lane-dense)
    cp = _round_up(n_classes, _LANE)     # padded NUM_CLASSES (lane-dense)
    tb, bp = _choose_batch_tile(B)

    f32, bf16 = jnp.float32, jnp.bfloat16

    # bf16 for the dominant streams (features, W) and centers; bias stays f32.
    x_p = jnp.pad(x_feat.astype(f32), ((0, bp - B), (0, 0))).astype(bf16)
    w_p = jnp.pad(fc_w.astype(f32), ((0, 0), (0, hp - hidden))).astype(bf16)
    b_p = jnp.pad(fc_b.astype(f32).reshape(1, hidden), ((0, 0), (0, hp - hidden)))
    c_p = jnp.pad(centers.astype(f32),
                  ((0, hp - hidden), (0, cp - n_classes))).astype(bf16)

    # ||c||^2 per class (loop-invariant, hoisted), computed in f32 from the
    # bf16-rounded centers the kernel will actually use.  Padded class lanes get
    # +_PAD_BIAS so the kernel needs no iota/select mask.
    c_r = c_p.astype(f32)
    cent_sq = jnp.sum(c_r * c_r, axis=0, keepdims=True)                 # (1, Cp)
    pad_bias = jnp.where(jnp.arange(cp)[None, :] >= n_classes,
                         _PAD_BIAS, 0.0).astype(f32)
    csq = cent_sq + pad_bias

    grid = (bp // tb,)
    kernel = functools.partial(_netxd_kernel, scale=float(scale))

    flops = 2 * bp * fc_dim * hp + 2 * bp * hp * cp
    bytes_accessed = (2 * (bp * fc_dim + fc_dim * hp + hp * cp)   # bf16 inputs
                      + 4 * (hp + cp)                             # f32 bias + csq
                      + 4 * (bp * hp + 2 * bp * cp))              # f32 outputs

    x1_p, nd_p, out_p = pl.pallas_call(
        kernel,
        out_shape=(
            jax.ShapeDtypeStruct((bp, hp), f32),
            jax.ShapeDtypeStruct((bp, cp), f32),
            jax.ShapeDtypeStruct((bp, cp), f32),
        ),
        grid=grid,
        in_specs=[
            pl.BlockSpec((tb, fc_dim), lambda i: (i, 0)),   # features: tiled over batch
            pl.BlockSpec((fc_dim, hp), lambda i: (0, 0)),   # W: VMEM-resident
            pl.BlockSpec((1, hp), lambda i: (0, 0)),        # b: VMEM-resident
            pl.BlockSpec((hp, cp), lambda i: (0, 0)),       # centers: VMEM-resident
            pl.BlockSpec((1, cp), lambda i: (0, 0)),        # ||c||^2 (+pad bias)
        ],
        out_specs=(
            pl.BlockSpec((tb, hp), lambda i: (i, 0)),
            pl.BlockSpec((tb, cp), lambda i: (i, 0)),
            pl.BlockSpec((tb, cp), lambda i: (i, 0)),
        ),
        compiler_params=pltpu.CompilerParams(
            dimension_semantics=("parallel",),
        ),
        cost_estimate=pl.CostEstimate(
            flops=flops,
            transcendentals=bp * cp,
            bytes_accessed=bytes_accessed,
        ),
    )(x_p, w_p, b_p, c_p, csq)

    x1 = x1_p[:B, :hidden]
    neg_dist = nd_p[:B, :n_classes]
    output = out_p[:B, :n_classes]
    return x1, centers, neg_dist, output


def _reference(x_feat, fc_w, fc_b, centers, scale=2.0):
    # Pure-JAX reference with exact (highest-precision) f32 matmuls.
    x1 = jnp.dot(x_feat, fc_w, precision="highest") + fc_b[None, :]
    feat_sq = jnp.sum(x1 ** 2, axis=1, keepdims=True)
    cent_sq = jnp.sum(centers ** 2, axis=0, keepdims=True)
    neg_dist = -(feat_sq + cent_sq - 2.0 * jnp.dot(x1, centers, precision="highest"))
    output = jax.nn.log_softmax(scale * neg_dist, axis=1)
    return x1, centers, neg_dist, output


def _check(B, FC_DIM, HIDDEN, NUM_CLASSES, SCALE, seed=0):
    key = jax.random.PRNGKey(seed)
    kx, kw, kb, kc = jax.random.split(key, 4)

    x_feat = jax.random.normal(kx, (B, FC_DIM), dtype=jnp.float32)
    fc_w = jax.random.normal(kw, (FC_DIM, HIDDEN), dtype=jnp.float32) * (1.0 / FC_DIM) ** 0.5
    fc_b = jax.random.normal(kb, (HIDDEN,), dtype=jnp.float32) * 0.01
    centers = jax.random.normal(kc, (HIDDEN, NUM_CLASSES), dtype=jnp.float32) * (2.0 / NUM_CLASSES) ** 0.5

    outs = netxd_forward(x_feat, fc_w, fc_b, centers, scale=SCALE)
    outs = jax.block_until_ready(outs)

    # Matched-precision reference: apply the same bf16 input rounding the kernel
    # uses, then compute in f32 -> tight tolerance is meaningful. (Against a pure
    # f32 reference the expected deviation is the ~0.4% bf16 input-rounding error.)
    bf = lambda a: a.astype(jnp.bfloat16).astype(jnp.float32)
    refs = _reference(bf(x_feat), bf(fc_w), fc_b, bf(centers), scale=SCALE)
    for name, got, want in (("x1", outs[0], refs[0]),
                            ("neg_dist", outs[2], refs[2]),
                            ("output", outs[3], refs[3])):
        assert got.shape == want.shape, (name, got.shape, want.shape)
        assert jnp.allclose(got, want, atol=5e-3, rtol=5e-3), (
            name, float(jnp.max(jnp.abs(got - want))))


if __name__ == "__main__":
    # Module defaults: num_hidden_units=2, num_classes=10, s=2,
    # swin_base head.in_features = 1024.
    _check(B=2, FC_DIM=1024, HIDDEN=2, NUM_CLASSES=10, SCALE=2.0)
    # Larger batch exercises the multi-step grid (2 tiles -> both v7x TCs) and
    # the batch-padding path.
    _check(B=300, FC_DIM=1024, HIDDEN=2, NUM_CLASSES=10, SCALE=2.0)
    print("KERNEL_OK")
</pallas_src>

<mosaic_0001>
module attributes {stable_mosaic.version = 11 : i64} {
  func.func @_netxd_kernel(%arg0: i32, %arg1: memref<16x1024xbf16, #tpu.memory_space<vmem>>, %arg2: memref<1024x128xbf16, #tpu.memory_space<vmem>>, %arg3: memref<1x128xf32, #tpu.memory_space<vmem>>, %arg4: memref<128x128xbf16, #tpu.memory_space<vmem>>, %arg5: memref<1x128xf32, #tpu.memory_space<vmem>>, %arg6: memref<16x128xf32, #tpu.memory_space<vmem>>, %arg7: memref<16x128xf32, #tpu.memory_space<vmem>>, %arg8: memref<16x128xf32, #tpu.memory_space<vmem>>) attributes {dimension_semantics = [#tpu.dimension_semantics<parallel>], iteration_bounds = array<i64: 1>, scalar_prefetch = 0 : i64, scratch_operands = 0 : i64, tpu.core_type = #tpu.core_type<tc>, window_params = [{transform_indices = @transform_0, window_bounds = array<i64: 16, 1024>}, {pipeline_mode = #tpu.pipeline_mode<synchronous>, transform_indices = @transform_1, window_bounds = array<i64: 1024, 128>}, {pipeline_mode = #tpu.pipeline_mode<synchronous>, transform_indices = @transform_2, window_bounds = array<i64: 1, 128>}, {pipeline_mode = #tpu.pipeline_mode<synchronous>, transform_indices = @transform_3, window_bounds = array<i64: 128, 128>}, {pipeline_mode = #tpu.pipeline_mode<synchronous>, transform_indices = @transform_4, window_bounds = array<i64: 1, 128>}, {transform_indices = @transform_5, window_bounds = array<i64: 16, 128>}, {transform_indices = @transform_6, window_bounds = array<i64: 16, 128>}, {transform_indices = @transform_7, window_bounds = array<i64: 16, 128>}]} {
    %c0 = arith.constant 0 : index
    %c0_0 = arith.constant 0 : index
    %0 = vector.load %arg1[%c0, %c0_0] : memref<16x1024xbf16, #tpu.memory_space<vmem>>, vector<16x1024xbf16>
    %c0_1 = arith.constant 0 : index
    %c0_2 = arith.constant 0 : index
    %1 = vector.load %arg2[%c0_1, %c0_2] : memref<1024x128xbf16, #tpu.memory_space<vmem>>, vector<1024x128xbf16>
    %cst = arith.constant dense<0.000000e+00> : vector<16x128xf32>
    %2 = tpu.matmul %0, %1, %cst {dimension_numbers = #tpu.dot_dimension_numbers<[1], [0], [0], [1], [0, 0, 1, 1], [], []>} : vector<16x1024xbf16>, vector<1024x128xbf16>, vector<16x128xf32> -> vector<16x128xf32>
    %c0_3 = arith.constant 0 : index
    %c0_4 = arith.constant 0 : index
    %3 = vector.load %arg3[%c0_3, %c0_4] : memref<1x128xf32, #tpu.memory_space<vmem>>, vector<1x128xf32>
    %4 = vector.broadcast %3 : vector<1x128xf32> to vector<16x128xf32>
    %5 = arith.addf %2, %4 : vector<16x128xf32>
    %c0_5 = arith.constant 0 : index
    %c0_6 = arith.constant 0 : index
    %6 = vector.load %arg6[%c0_5, %c0_6] : memref<16x128xf32, #tpu.memory_space<vmem>>, vector<16x128xf32>
    tpu.vector_store %arg6[%c0_5, %c0_6], %5 {strides = array<i32>} : memref<16x128xf32, #tpu.memory_space<vmem>>, vector<16x128xf32>,
    %7 = arith.mulf %5, %5 : vector<16x128xf32>
    %cst_7 = arith.constant dense<0.000000e+00> : vector<16xf32>
    %8 = vector.multi_reduction <add>, %7, %cst_7 [1] : vector<16x128xf32> to vector<16xf32>
    %9 = vector.shape_cast %8 : vector<16xf32> to vector<16x1xf32>
    %c0_8 = arith.constant 0 : index
    %c0_9 = arith.constant 0 : index
    %10 = vector.load %arg4[%c0_8, %c0_9] : memref<128x128xbf16, #tpu.memory_space<vmem>>, vector<128x128xbf16>
    %11 = arith.extf %10 : vector<128x128xbf16> to vector<128x128xf32>
    %cst_10 = arith.constant dense<0.000000e+00> : vector<16x128xf32>
    %12 = tpu.matmul %5, %11, %cst_10 {dimension_numbers = #tpu.dot_dimension_numbers<[1], [0], [0], [1], [0, 0, 1, 1], [], []>} : vector<16x128xf32>, vector<128x128xf32>, vector<16x128xf32> -> vector<16x128xf32>
    %cst_11 = arith.constant 2.000000e+00 : f32
    %13 = vector.broadcast %cst_11 : f32 to vector<16x128xf32>
    %14 = arith.mulf %13, %12 : vector<16x128xf32>
    %15 = vector.broadcast %9 : vector<16x1xf32> to vector<16x128xf32>
    %16 = arith.subf %14, %15 : vector<16x128xf32>
    %c0_12 = arith.constant 0 : index
    %c0_13 = arith.constant 0 : index
    %17 = vector.load %arg5[%c0_12, %c0_13] : memref<1x128xf32, #tpu.memory_space<vmem>>, vector<1x128xf32>
    %18 = vector.broadcast %17 : vector<1x128xf32> to vector<16x128xf32>
    %19 = arith.subf %16, %18 : vector<16x128xf32>
    %c0_14 = arith.constant 0 : index
    %c0_15 = arith.constant 0 : index
    %20 = vector.load %arg7[%c0_14, %c0_15] : memref<16x128xf32, #tpu.memory_space<vmem>>, vector<16x128xf32>
    tpu.vector_store %arg7[%c0_14, %c0_15], %19 {strides = array<i32>} : memref<16x128xf32, #tpu.memory_space<vmem>>, vector<16x128xf32>,
    %cst_16 = arith.constant 2.000000e+00 : f32
    %21 = vector.broadcast %cst_16 : f32 to vector<16x128xf32>
    %22 = arith.mulf %21, %19 : vector<16x128xf32>
    %cst_17 = arith.constant dense<0xFF800000> : vector<16xf32>
    %23 = vector.multi_reduction <maximumf>, %22, %cst_17 [1] : vector<16x128xf32> to vector<16xf32>
    %24 = vector.shape_cast %23 : vector<16xf32> to vector<16x1xf32>
    %25 = vector.broadcast %24 : vector<16x1xf32> to vector<16x128xf32>
    %26 = arith.subf %22, %25 : vector<16x128xf32>
    %27 = math.exp %26 : vector<16x128xf32>
    %cst_18 = arith.constant dense<0.000000e+00> : vector<16xf32>
    %28 = vector.multi_reduction <add>, %27, %cst_18 [1] : vector<16x128xf32> to vector<16xf32>
    %29 = vector.shape_cast %28 : vector<16xf32> to vector<16x1xf32>
    %30 = math.log %29 : vector<16x1xf32>
    %31 = arith.addf %30, %24 : vector<16x1xf32>
    %32 = vector.broadcast %31 : vector<16x1xf32> to vector<16x128xf32>
    %33 = arith.subf %22, %32 : vector<16x128xf32>
    %c0_19 = arith.constant 0 : index
    %c0_20 = arith.constant 0 : index
    %34 = vector.load %arg8[%c0_19, %c0_20] : memref<16x128xf32, #tpu.memory_space<vmem>>, vector<16x128xf32>
    tpu.vector_store %arg8[%c0_19, %c0_20], %33 {strides = array<i32>} : memref<16x128xf32, #tpu.memory_space<vmem>>, vector<16x128xf32>,
    return
  }
  func.func @transform_0(%arg0: i32) -> (i32, i32) {
    %c0_i32 = arith.constant 0 : i32
    %c0_i32_0 = arith.constant 0 : i32
    return %arg0, %c0_i32 : i32, i32
  }
  func.func @transform_1(%arg0: i32) -> (i32, i32) {
    %c0_i32 = arith.constant 0 : i32
    %c0_i32_0 = arith.constant 0 : i32
    %c0_i32_1 = arith.constant 0 : i32
    return %c0_i32, %c0_i32_0 : i32, i32
  }
  func.func @transform_2(%arg0: i32) -> (i32, i32) {
    %c0_i32 = arith.constant 0 : i32
    %c0_i32_0 = arith.constant 0 : i32
    %c0_i32_1 = arith.constant 0 : i32
    return %c0_i32, %c0_i32_0 : i32, i32
  }
  func.func @transform_3(%arg0: i32) -> (i32, i32) {
    %c0_i32 = arith.constant 0 : i32
    %c0_i32_0 = arith.constant 0 : i32
    %c0_i32_1 = arith.constant 0 : i32
    return %c0_i32, %c0_i32_0 : i32, i32
  }
  func.func @transform_4(%arg0: i32) -> (i32, i32) {
    %c0_i32 = arith.constant 0 : i32
    %c0_i32_0 = arith.constant 0 : i32
    %c0_i32_1 = arith.constant 0 : i32
    return %c0_i32, %c0_i32_0 : i32, i32
  }
  func.func @transform_5(%arg0: i32) -> (i32, i32) {
    %c0_i32 = arith.constant 0 : i32
    %c0_i32_0 = arith.constant 0 : i32
    return %arg0, %c0_i32 : i32, i32
  }
  func.func @transform_6(%arg0: i32) -> (i32, i32) {
    %c0_i32 = arith.constant 0 : i32
    %c0_i32_0 = arith.constant 0 : i32
    return %arg0, %c0_i32 : i32, i32
  }
  func.func @transform_7(%arg0: i32) -> (i32, i32) {
    %c0_i32 = arith.constant 0 : i32
    %c0_i32_0 = arith.constant 0 : i32
    return %arg0, %c0_i32 : i32, i32
  }
}

</mosaic_0001>

<bundles_post_ra>
// kernel: tpu_custom_call.1
= control target key start
LH: loop header
LB: loop body
LE: loop exit
PB: predicated region body
PF: predicated region fallthrough
CT: control target
= control target key end

     0   :  { %13 = vsyncpa [#allocation3], 0  ;;  %s1663_s0 = inlined_call_operand.hbm [shape: bf16[16,1024], index: 0, kind: input, shape index: {}]   ;;  %s1664_s1 = inlined_call_operand.hbm [shape: bf16[1024,128], index: 1, kind: input, shape index: {}]   ;;  %s1665_s2 = inlined_call_operand.vmem [shape: f32[1,128], index: 2, kind: input, shape index: {}]   ;;  %s1666_s3 = inlined_call_operand.hbm [shape: bf16[128,128], index: 3, kind: input, shape index: {}]   ;;  %s1667_s4 = inlined_call_operand.vmem [shape: f32[1,128], index: 4, kind: input, shape index: {}]   ;;  %s1668_s5 = inlined_call_operand.hbm [shape: f32[16,128], index: 5, kind: output, shape index: {0}]   ;;  %s1669_s6 = inlined_call_operand.hbm [shape: f32[16,128], index: 6, kind: output, shape index: {1}]   ;;  %s1670_s7 = inlined_call_operand.hbm [shape: f32[16,128], index: 7, kind: output, shape index: {2}]  }
   0x1   :  { %14 = vsyncpa [#allocation6], 0 }
   0x2   :  { %15 = vsyncpa [#allocation4], 0 }
   0x3   :  { %16 = vsyncpa [#allocation10], 0  ;;  %s1513_s24 = smov [#allocation5]   ;;  %s1373_s28 = scalar_lea.hbm %s1664_s1, 8192 }
   0x4   :  { %s34_s25 = sshll.u32 %s1513_s24, 4  ;;  %p1374_p0 = scmp.ne.s32.totalorder %s1664_s1, %s1373_s28  ;;  %s35_s25 = int_to_ptr.vmem [resolvable:$true] %s34_s25 }
   0x5   :  { %p1377_p1 = scmp.lt.u32.totalorder %s1373_s28, %s1664_s1 }
   0x7   :  { %p1379_p2 = pnand %p1377_p1, %p1374_p0 }
   0x9   :  { %1382 = shalt.err (!%p1379_p2)
}
   0xa   :  { %s1383_s10 = scalar_lea.vmem %s35_s25, 8192  ;;  %p1388_p4 = scmp.lt.s32.totalorder %s35_s25, %s35_s25 }
   0xb   :  { %p1384_p3 = scmp.ne.s32.totalorder %s35_s25, %s1383_s10  ;;  %p1389_p5 = scmp.lt.s32.totalorder %s1383_s10, %s1383_s10 }
   0xd   :  { %p1390_p6 = por %p1389_p5, %p1388_p4 }
   0xf   :  { %p1391_p7 = pnand %p1390_p6, %p1384_p3 }
  0x11   :  { %1394 = shalt.err (!%p1391_p7)
}
  0x12   :  { %s1514_s11 = smov 64   ;;  %s1515_s12 = smov 4  }
  0x13   :  { %40 = dma.hbm_to_vmem [thread:$0]  %s1664_s1, 8192, %s35_s25, [#allocation6], %s1514_s11, %s1514_s11, %s1515_s12  }
  0x14   :  { %s1516_s15 = smov [#allocation2]   ;;  %s1395_s19 = scalar_lea.hbm %s1663_s0, 1024 }
  0x15   :  { %s22_s16 = sshll.u32 %s1516_s15, 4  ;;  %p1396_p8 = scmp.ne.s32.totalorder %s1663_s0, %s1395_s19  ;;  %s23_s16 = int_to_ptr.vmem [resolvable:$true] %s22_s16 }
  0x16   :  { %p1399_p9 = scmp.lt.u32.totalorder %s1395_s19, %s1663_s0 }
  0x18   :  { %p1401_p10 = pnand %p1399_p9, %p1396_p8 }
  0x1a   :  { %1404 = shalt.err (!%p1401_p10)
}
  0x1b   :  { %s1405_s24 = scalar_lea.vmem %s23_s16, 1024  ;;  %p1410_p12 = scmp.lt.s32.totalorder %s23_s16, %s23_s16 }
  0x1c   :  { %p1406_p11 = scmp.ne.s32.totalorder %s23_s16, %s1405_s24  ;;  %p1411_p13 = scmp.lt.s32.totalorder %s1405_s24, %s1405_s24 }
  0x1e   :  { %p1412_p0 = por %p1411_p13, %p1410_p12 }
  0x20   :  { %p1413_p1 = pnand %p1412_p0, %p1406_p11 }
  0x22   :  { %1416 = shalt.err (!%p1413_p1)
}
  0x23   :  { %s1517_s1 = smov 512   ;;  %s1518_s25 = smov 32  }
  0x24   :  { %28 = dma.hbm_to_vmem [thread:$0]  %s1663_s0, 1024, %s23_s16, [#allocation3], %s1517_s1, %s1517_s1, %s1518_s25  }
  0x25   :  { %s1519_s28 = smov [#allocation7]   ;;  %s1417_s9 = scalar_lea.hbm %s1666_s3, 1024 }
  0x26   :  { %s48_s29 = sshll.u32 %s1519_s28, 4  ;;  %p1418_p2 = scmp.ne.s32.totalorder %s1666_s3, %s1417_s9  ;;  %s49_s29 = int_to_ptr.vmem [resolvable:$true] %s48_s29 }
  0x27   :  { %p1421_p3 = scmp.lt.u32.totalorder %s1417_s9, %s1666_s3 }
  0x29   :  { %p1423_p4 = pnand %p1421_p3, %p1418_p2 }
  0x2b   :  { %1426 = shalt.err (!%p1423_p4)
}
  0x2c   :  { %s1427_s17 = scalar_lea.vmem %s49_s29, 1024  ;;  %p1432_p6 = scmp.lt.s32.totalorder %s49_s29, %s49_s29 }
  0x2d   :  { %p1428_p5 = scmp.ne.s32.totalorder %s49_s29, %s1427_s17  ;;  %p1433_p7 = scmp.lt.s32.totalorder %s1427_s17, %s1427_s17 }
  0x2f   :  { %p1434_p8 = por %p1433_p7, %p1432_p6 }
  0x31   :  { %p1435_p9 = pnand %p1434_p8, %p1428_p5 }
  0x33   :  { %1438 = shalt.err (!%p1435_p9)
}
  0x34   :  { %54 = dma.hbm_to_vmem [thread:$0]  %s1666_s3, 1024, %s49_s29, [#allocation6], %s1514_s11, %s1514_s11, %s1515_s12  }
  0x35   :  { %1505 = dma.done.wait [#allocation3], 1024  }
  0x36   :  { %1506 = vsyncadd [#allocation3], 4294966272 }
  0x37   :  { %1507 = dma.done.wait [#allocation6], 9216  }
  0x38   :  { %1508 = vsyncadd [#allocation6], 4294958080  ;;  %v1301_v0 = vld [vmem:[#allocation5 + $0x40] sm:$0xff]   ;;  %v1305_v4 = vld [vmem:[#allocation5 + $0x48] sm:$0xff]   ;;  %s1521_s19 = smov [#allocation8]  }
  0x39   :  { %v1302_v1 = vld [vmem:[#allocation5 + $0xc0] sm:$0xff]   ;;  %1116 = vmatprep.subr.bf16.mxu0 %v1301_v0  ;;  %v1306_v5 = vld [vmem:[#allocation5 + $0xc8] sm:$0xff]   ;;  %v1309_v8 = vld [vmem:[#allocation5 + $0x50] sm:$0xff]   ;;  %s959_s20 = sshll.u32 %s1521_s19, 4  ;;  %s960_s20 = int_to_ptr.vmem [resolvable:$true] %s959_s20 }
  0x3a   :  { %v1303_v2 = vld [vmem:[#allocation5] sm:$0xff]   ;;  %1138 = vmatprep.subr.bf16.mxu1 %v1302_v1  ;;  %v1307_v6 = vld [vmem:[#allocation5 + $0x8] sm:$0xff]   ;;  %v1310_v9 = vld [vmem:[#allocation5 + $0xd0] sm:$0xff]  }
  0x3b   :  { %v1304_v3 = vld [vmem:[#allocation5 + $0x80] sm:$0xff]   ;;  %1117 = vmatpush3.bf16.msra.mxu0 %v1303_v2  ;;  %v1308_v7 = vld [vmem:[#allocation5 + $0x88] sm:$0xff]   ;;  %v1311_v10 = vld [vmem:[#allocation5 + $0x10] sm:$0xff]  }
  0x3c   :  { %1139 = vmatpush3.bf16.msra.mxu1 %v1304_v3  ;;  %1118 = vmatprep.subr.bf16.mxu0 %v1305_v4  ;;  %v1312_v11 = vld [vmem:[#allocation5 + $0x90] sm:$0xff]   ;;  %v1313_v12 = vld [vmem:[#allocation5 + $0x58] sm:$0xff]   ;;  %v1317_v16 = vld [vmem:[#allocation5 + $0x60] sm:$0xff]  }
  0x3d   :  { %1140 = vmatprep.subr.bf16.mxu1 %v1306_v5  ;;  %v1314_v13 = vld [vmem:[#allocation5 + $0xd8] sm:$0xff]   ;;  %v1318_v17 = vld [vmem:[#allocation5 + $0xe0] sm:$0xff]   ;;  %v1321_v20 = vld [vmem:[#allocation5 + $0x68] sm:$0xff]  }
  0x3e   :  { %v1315_v14 = vld [vmem:[#allocation5 + $0x18] sm:$0xff]   ;;  %v1319_v18 = vld [vmem:[#allocation5 + $0x20] sm:$0xff]   ;;  %v1322_v21 = vld [vmem:[#allocation5 + $0xe8] sm:$0xff]  }
  0x3f   :  { %1119 = vmatpush3.bf16.msra.mxu0 %v1307_v6  ;;  %v1316_v15 = vld [vmem:[#allocation5 + $0x98] sm:$0xff]   ;;  %v1320_v19 = vld [vmem:[#allocation5 + $0xa0] sm:$0xff]   ;;  %v1323_v22 = vld [vmem:[#allocation5 + $0x28] sm:$0xff]  }
  0x40   :  { %1141 = vmatpush3.bf16.msra.mxu1 %v1308_v7  ;;  %1120 = vmatprep.subr.bf16.mxu0 %v1309_v8  ;;  %v1324_v23 = vld [vmem:[#allocation5 + $0xa8] sm:$0xff]   ;;  %v1325_v24 = vld [vmem:[#allocation5 + $0x70] sm:$0xff]   ;;  %v1329_v28 = vld [vmem:[#allocation5 + $0x78] sm:$0xff]  }
  0x41   :  { %1142 = vmatprep.subr.bf16.mxu1 %v1310_v9  ;;  %v1326_v25 = vld [vmem:[#allocation5 + $0xf0] sm:$0xff]   ;;  %v1330_v29 = vld [vmem:[#allocation5 + $0xf8] sm:$0xff]   ;;  %v67_v32 = vld [vmem:[#allocation2] sm:$0xff] }
  0x42   :  { %v1327_v26 = vld [vmem:[#allocation5 + $0x30] sm:$0xff]   ;;  %v1331_v30 = vld [vmem:[#allocation5 + $0x38] sm:$0xff]   ;;  %v71_v33 = vld [vmem:[#allocation2 + $0x20] sm:$0xff] }
  0x43   :  { %1121 = vmatpush3.bf16.msra.mxu0 %v1311_v10  ;;  %v1328_v27 = vld [vmem:[#allocation5 + $0xb0] sm:$0xff]   ;;  %v1332_v31 = vld [vmem:[#allocation5 + $0xb8] sm:$0xff]   ;;  %v68_v34 = vld [vmem:[#allocation2 + $0x8] sm:$0xff]  ;;  %v1004_v35 = vcombine.low %v67_v32, %v71_v33  ;;  %v1005_v36 = vcombine.high %v67_v32, %v71_v33 }
  0x44   :  { %1143 = vmatpush3.bf16.msra.mxu1 %v1312_v11  ;;  %1122 = vmatprep.subr.bf16.mxu0 %v1313_v12  ;;  %v72_v37 = vld [vmem:[#allocation2 + $0x28] sm:$0xff]  ;;  %v1333_v40 = vld [vmem:[#allocation5 + $0x140] sm:$0xff]   ;;  %v1341_v48 = vld [vmem:[#allocation5 + $0x150] sm:$0xff]  }
  0x45   :  { %1144 = vmatprep.subr.bf16.mxu1 %v1314_v13  ;;  %v1006_v38 = vcombine.low %v68_v34, %v72_v37  ;;  %v1007_v39 = vcombine.high %v68_v34, %v72_v37  ;;  %666 = vmatprep.mubr.bf16.mxu0 %v1005_v36  ;;  %v1334_v41 = vld [vmem:[#allocation5 + $0x1c0] sm:$0xff]   ;;  %v1337_v44 = vld [vmem:[#allocation5 + $0x148] sm:$0xff]   ;;  %v1342_v49 = vld [vmem:[#allocation5 + $0x1d0] sm:$0xff]  }
  0x46   :  { %v1335_v42 = vld [vmem:[#allocation5 + $0x100] sm:$0xff]   ;;  %v1338_v45 = vld [vmem:[#allocation5 + $0x1c8] sm:$0xff]   ;;  %v1343_v50 = vld [vmem:[#allocation5 + $0x110] sm:$0xff]  }
  0x47   :  { %1123 = vmatpush3.bf16.msra.mxu0 %v1315_v14  ;;  %707 = vmatprep.mubr.bf16.mxu1 %v1007_v39  ;;  %v1336_v43 = vld [vmem:[#allocation5 + $0x180] sm:$0xff]   ;;  %v1339_v46 = vld [vmem:[#allocation5 + $0x108] sm:$0xff]   ;;  %v1344_v51 = vld [vmem:[#allocation5 + $0x190] sm:$0xff]  }
  0x48   :  { %1145 = vmatpush3.bf16.msra.mxu1 %v1316_v15  ;;  %1124 = vmatprep.subr.bf16.mxu0 %v1317_v16  ;;  %v1340_v47 = vld [vmem:[#allocation5 + $0x188] sm:$0xff]   ;;  %v1345_v52 = vld [vmem:[#allocation5 + $0x158] sm:$0xff]   ;;  %v1349_v56 = vld [vmem:[#allocation5 + $0x160] sm:$0xff]  }
  0x49   :  { %1146 = vmatprep.subr.bf16.mxu1 %v1318_v17  ;;  %v1346_v53 = vld [vmem:[#allocation5 + $0x1d8] sm:$0xff]   ;;  %v1350_v57 = vld [vmem:[#allocation5 + $0x1e0] sm:$0xff]   ;;  %v1353_v60 = vld [vmem:[#allocation5 + $0x168] sm:$0xff]  }
  0x4a   :  { %v1347_v54 = vld [vmem:[#allocation5 + $0x118] sm:$0xff]   ;;  %v1351_v58 = vld [vmem:[#allocation5 + $0x120] sm:$0xff]   ;;  %v1354_v61 = vld [vmem:[#allocation5 + $0x1e8] sm:$0xff]  }
  0x4b   :  { %1125 = vmatpush3.bf16.msra.mxu0 %v1319_v18  ;;  %v1348_v55 = vld [vmem:[#allocation5 + $0x198] sm:$0xff]   ;;  %v1352_v59 = vld [vmem:[#allocation5 + $0x1a0] sm:$0xff]   ;;  %v1355_v62 = vld [vmem:[#allocation5 + $0x128] sm:$0xff]  }
  0x4c   :  { %1147 = vmatpush3.bf16.msra.mxu1 %v1320_v19  ;;  %1126 = vmatprep.subr.bf16.mxu0 %v1321_v20  ;;  %v1356_v63 = vld [vmem:[#allocation5 + $0x1a8] sm:$0xff]   ;;  %v1357_v0 = vld [vmem:[#allocation5 + $0x170] sm:$0xff]   ;;  %v1361_v4 = vld [vmem:[#allocation5 + $0x178] sm:$0xff]  }
  0x4d   :  { %1148 = vmatprep.subr.bf16.mxu1 %v1322_v21  ;;  %v1358_v1 = vld [vmem:[#allocation5 + $0x1f0] sm:$0xff]   ;;  %v1362_v5 = vld [vmem:[#allocation5 + $0x1f8] sm:$0xff]   ;;  %v1078_v16 = vld [vmem:[#allocation7] sm:$0xff]  }
  0x4e   :  { %v1359_v2 = vld [vmem:[#allocation5 + $0x130] sm:$0xff]   ;;  %v1363_v6 = vld [vmem:[#allocation5 + $0x138] sm:$0xff]   ;;  %v1109_v17 = vld [vmem:[#allocation7 + $0x8] sm:$0xff]  }
  0x4f   :  { %1127 = vmatpush3.bf16.msra.mxu0 %v1323_v22  ;;  %v1360_v3 = vld [vmem:[#allocation5 + $0x1b0] sm:$0xff]   ;;  %v1364_v7 = vld [vmem:[#allocation5 + $0x1b8] sm:$0xff]   ;;  %v1112_v20 = vld [vmem:[#allocation7 + $0x20] sm:$0xff]  }
  0x50   :  { %1149 = vmatpush3.bf16.msra.mxu1 %v1324_v23  ;;  %1128 = vmatprep.subr.bf16.mxu0 %v1325_v24  ;;  %v69_v8 = vld [vmem:[#allocation2 + $0x10] sm:$0xff]  ;;  %v70_v12 = vld [vmem:[#allocation2 + $0x18] sm:$0xff]  ;;  %v1113_v21 = vld [vmem:[#allocation7 + $0x28] sm:$0xff]  }
  0x51   :  { %1150 = vmatprep.subr.bf16.mxu1 %v1326_v25  ;;  %v73_v9 = vld [vmem:[#allocation2 + $0x30] sm:$0xff]  ;;  %v74_v13 = vld [vmem:[#allocation2 + $0x38] sm:$0xff] }
  0x52   :  { %v1008_v10 = vcombine.low %v69_v8, %v73_v9  ;;  %v1009_v11 = vcombine.high %v69_v8, %v73_v9  ;;  %v1010_v14 = vcombine.low %v70_v12, %v74_v13  ;;  %v1011_v15 = vcombine.high %v70_v12, %v74_v13  ;;  %v1110_v18 = vld [vmem:[#allocation7 + $0x10] sm:$0xff]   ;;  %v1111_v19 = vld [vmem:[#allocation7 + $0x18] sm:$0xff]  }
  0x53   :  { %1129 = vmatpush3.bf16.msra.mxu0 %v1327_v26  ;;  %v1114_v22 = vld [vmem:[#allocation7 + $0x30] sm:$0xff]   ;;  %v1115_v23 = vld [vmem:[#allocation7 + $0x38] sm:$0xff]   ;;  %v1003_v26 = vld [vmem:[%s1665_s2] ss:$0 sm:$0xff] }
  0x54   :  { %1151 = vmatpush3.bf16.msra.mxu1 %v1328_v27  ;;  %1130 = vmatprep.subr.bf16.mxu0 %v1329_v28 }
  0x55   :  { %1152 = vmatprep.subr.bf16.mxu1 %v1330_v29 }
  0x57   :  { %1131 = vmatpush3.bf16.msra.mxu0 %v1331_v30 }
  0x58   :  { %1153 = vmatpush3.bf16.msra.mxu1 %v1332_v31  ;;  %1160 = vmatprep.subr.bf16.mxu0 %v1333_v40 }
  0x59   :  { %1182 = vmatprep.subr.bf16.mxu1 %v1334_v41 }
  0x5a   :  { %667 = vmatmul.mubr.bf16.vlgmr.msra.gmra.mrb[0].mxu0 %v1004_v35 }
  0x5b   :  { %708 = vmatmul.mubr.bf16.vlgmr.msra.gmra.mrb[0].mxu1 %v1006_v38  ;;  %1161 = vmatpush3.bf16.msra.mxu0 %v1335_v42 }
  0x5c   :  { %1183 = vmatpush3.bf16.msra.mxu1 %v1336_v43  ;;  %1162 = vmatprep.subr.bf16.mxu0 %v1337_v44 }
  0x5d   :  { %1184 = vmatprep.subr.bf16.mxu1 %v1338_v45  ;;  %748 = vmatprep.mubr.bf16.mxu0 %v1009_v11 }
  0x5e   :  { %789 = vmatprep.mubr.bf16.mxu1 %v1011_v15 }
  0x5f   :  { %1163 = vmatpush3.bf16.msra.mxu0 %v1339_v46 }
  0x60   :  { %1185 = vmatpush3.bf16.msra.mxu1 %v1340_v47  ;;  %1164 = vmatprep.subr.bf16.mxu0 %v1341_v48 }
  0x61   :  { %1186 = vmatprep.subr.bf16.mxu1 %v1342_v49 }
  0x63   :  { %1165 = vmatpush3.bf16.msra.mxu0 %v1343_v50 }
  0x64   :  { %1187 = vmatpush3.bf16.msra.mxu1 %v1344_v51  ;;  %1166 = vmatprep.subr.bf16.mxu0 %v1345_v52 }
  0x65   :  { %1188 = vmatprep.subr.bf16.mxu1 %v1346_v53 }
  0x67   :  { %1167 = vmatpush3.bf16.msra.mxu0 %v1347_v54 }
  0x68   :  { %1189 = vmatpush3.bf16.msra.mxu1 %v1348_v55  ;;  %1168 = vmatprep.subr.bf16.mxu0 %v1349_v56 }
  0x69   :  { %1190 = vmatprep.subr.bf16.mxu1 %v1350_v57 }
  0x6b   :  { %1169 = vmatpush3.bf16.msra.mxu0 %v1351_v58 }
  0x6c   :  { %1191 = vmatpush3.bf16.msra.mxu1 %v1352_v59  ;;  %1170 = vmatprep.subr.bf16.mxu0 %v1353_v60 }
  0x6d   :  { %1192 = vmatprep.subr.bf16.mxu1 %v1354_v61 }
  0x6f   :  { %1171 = vmatpush3.bf16.msra.mxu0 %v1355_v62 }
  0x70   :  { %1193 = vmatpush3.bf16.msra.mxu1 %v1356_v63  ;;  %1172 = vmatprep.subr.bf16.mxu0 %v1357_v0  ;;  %v1076_v0 = vld [vmem:[%s1667_s4] ss:$0 sm:$0xff]  ;;  %s1520_s4 = smov [#allocation9]  }
  0x71   :  { %1194 = vmatprep.subr.bf16.mxu1 %v1358_v1  ;;  %s971_s18 = sshll.u32 %s1520_s4, 4  ;;  %s972_s18 = int_to_ptr.vmem [resolvable:$true] %s971_s18 }
  0x72   :  { %s1439_s21 = scalar_lea.vmem %s972_s18, 256  ;;  %p1444_p11 = scmp.lt.s32.totalorder %s972_s18, %s972_s18 }
  0x73   :  { %1173 = vmatpush3.bf16.msra.mxu0 %v1359_v2  ;;  %p1440_p10 = scmp.ne.s32.totalorder %s972_s18, %s1439_s21  ;;  %p1445_p12 = scmp.lt.s32.totalorder %s1439_s21, %s1439_s21 }
  0x74   :  { %1195 = vmatpush3.bf16.msra.mxu1 %v1360_v3  ;;  %1174 = vmatprep.subr.bf16.mxu0 %v1361_v4 }
  0x75   :  { %1196 = vmatprep.subr.bf16.mxu1 %v1362_v5  ;;  %p1446_p13 = por %p1445_p12, %p1444_p11 }
  0x77   :  { %1175 = vmatpush3.bf16.msra.mxu0 %v1363_v6  ;;  %p1447_p0 = pnand %p1446_p13, %p1440_p10 }
  0x78   :  { %1197 = vmatpush3.bf16.msra.mxu1 %v1364_v7  ;;  %1258 = vmatprep.subr.bf16.mxu0 %v1078_v16 }
  0x7a   :  { %749 = vmatmul.mubr.bf16.vlgmr.msra.gmra.mrb[4].mxu0 %v1008_v10 }
  0x7b   :  { %790 = vmatmul.mubr.bf16.vlgmr.msra.gmra.mrb[4].mxu1 %v1010_v14  ;;  %1260 = vmatpush3.bf16.msra.mxu0 %v1078_v16 }
  0x7c   :  { %1262 = vmatprep.subr.bf16.mxu0 %v1109_v17 }
  0x7f   :  { %1264 = vmatpush3.bf16.msra.mxu0 %v1109_v17 }
  0x80   :  { %1266 = vmatprep.subr.bf16.mxu0 %v1110_v18 }
  0x83   :  { %1268 = vmatpush3.bf16.msra.mxu0 %v1110_v18 }
  0x84   :  { %1270 = vmatprep.subr.bf16.mxu0 %v1111_v19 }
  0x87   :  { %1272 = vmatpush3.bf16.msra.mxu0 %v1111_v19 }
  0x88   :  { %1274 = vmatprep.subr.bf16.mxu0 %v1112_v20 }
  0x8b   :  { %1276 = vmatpush3.bf16.msra.mxu0 %v1112_v20 }
  0x8c   :  { %1278 = vmatprep.subr.bf16.mxu0 %v1113_v21 }
  0x8f   :  { %1280 = vmatpush3.bf16.msra.mxu0 %v1113_v21 }
  0x90   :  { %1282 = vmatprep.subr.bf16.mxu0 %v1114_v22 }
  0x93   :  { %1284 = vmatpush3.bf16.msra.mxu0 %v1114_v22 }
  0x94   :  { %1286 = vmatprep.subr.bf16.mxu0 %v1115_v23 }
  0x97   :  { %1288 = vmatpush3.bf16.msra.mxu0 %v1115_v23 }
 0x12d   :  { %v1132_v24 = vpop.f32.mrb[0].mxu0 }
 0x12e   :  { %v1154_v25 = vpop.f32.mrb[0].mxu1  ;;  %v1133_v27 = vpop.f32.mrb[1].mxu0 }
 0x12f   :  { %v1134_v28 = vadd.f32 %v1133_v27, %v1132_v24  ;;  %v1155_v29 = vpop.f32.mrb[1].mxu1  ;;  %v1135_v30 = vpop.f32.mrb[2].mxu0 }
 0x130   :  { %v1156_v31 = vadd.f32 %v1155_v29, %v1154_v25  ;;  %v1157_v32 = vpop.f32.mrb[2].mxu1  ;;  %v1136_v33 = vpop.f32.mrb[3].mxu0 }
 0x131   :  { %v669_v34 = vadd.f32 %v1134_v28, %v1003_v26  ;;  %v1137_v35 = vadd.f32 %v1136_v33, %v1135_v30  ;;  %v1158_v36 = vpop.f32.mrb[3].mxu1 }
 0x132   :  { %v1159_v37 = vadd.f32 %v1158_v36, %v1157_v32 }
 0x133   :  { %v710_v38 = vadd.f32 %v1156_v31, %v669_v34  ;;  %v672_v39 = vadd.f32 %v1137_v35, %v1003_v26 }
 0x135   :  { %v713_v40 = vadd.f32 %v1159_v37, %v672_v39 }
 0x14d   :  { %v1176_v41 = vpop.f32.mrb[4].mxu0 }
 0x14e   :  { %v1198_v42 = vpop.f32.mrb[4].mxu1  ;;  %v1177_v43 = vpop.f32.mrb[5].mxu0 }
 0x14f   :  { %v1178_v44 = vadd.f32 %v1177_v43, %v1176_v41  ;;  %v1199_v45 = vpop.f32.mrb[5].mxu1  ;;  %v1179_v46 = vpop.f32.mrb[6].mxu0 }
 0x150   :  { %v1200_v47 = vadd.f32 %v1199_v45, %v1198_v42  ;;  %v1201_v48 = vpop.f32.mrb[6].mxu1  ;;  %v1180_v49 = vpop.f32.mrb[7].mxu0 }
 0x151   :  { %v751_v50 = vadd.f32 %v1178_v44, %v710_v38  ;;  %v1181_v51 = vadd.f32 %v1180_v49, %v1179_v46  ;;  %v1202_v52 = vpop.f32.mrb[7].mxu1 }
 0x152   :  { %v1203_v53 = vadd.f32 %v1202_v52, %v1201_v48 }
 0x153   :  { %v792_v54 = vadd.f32 %v1200_v47, %v751_v50  ;;  %v754_v55 = vadd.f32 %v1181_v51, %v713_v40 }
 0x155   :  { %798 = vst [vmem:[#allocation8] sm:$0xff] %v792_v54  ;;  %v795_v56 = vadd.f32 %v1203_v53, %v754_v55  ;;  %1254 = vmatprep.mubr.f32.mxu0 %v792_v54  ;;  %v800_v57 = vmul.f32 %v792_v54, %v792_v54 }
 0x157   :  { %799 = vst [vmem:[#allocation8 + $0x8] sm:$0xff] %v795_v56  ;;  %1255 = vmatmul.mubr.f32.vlgmr.msra.gmra.mrb[8].mxu0 %v795_v56  ;;  %802 = vadd.xlane.f32.xlu0 %v800_v57  ;;  %v801_v58 = vmul.f32 %v795_v56, %v795_v56 }
 0x15b   :  { %804 = vadd.xlane.f32.xlu0 %v801_v58 }
 0x1e4   :  { %v803_v59 = vpop.xlane.xlu0 %802 }
 0x1e8   :  { %v805_v63 = vpop.xlane.xlu0 %804 }
 0x22a   :  { %v1256_v60 = vpop.f32.mrb[8].mxu0 }
 0x22b   :  { %v914_v61 = vmul.f32 2.0, %v1256_v60  ;;  %v904_v62 = vpop.f32.mrb[9].mxu0 }
 0x22c   :  { %v913_v1 = vmul.f32 2.0, %v904_v62 }
 0x22d   :  { %v916_v2 = vsub.f32 %v914_v61, %v805_v63 }
 0x22e   :  { %v915_v3 = vsub.f32 %v913_v1, %v803_v59 }
 0x22f   :  { %v925_v4 = vsub.f32 %v916_v2, %v1076_v0 }
 0x230   :  { %v924_v5 = vsub.f32 %v915_v3, %v1076_v0 }
 0x231   :  { %927 = vst [vmem:[#allocation9 + $0x8] sm:$0xff] %v925_v4  ;;  %v1613_v7 = vmul.f32 2.0, %v925_v4 }
 0x232   :  { %926 = vst [vmem:[#allocation9] sm:$0xff] %v924_v5  ;;  %v928_v6 = vmul.f32 2.0, %v924_v5 }
 0x234   :  { %930 = vmax.xlane.f32.xlu1 %v928_v6 }
 0x238   :  { %932 = vmax.xlane.f32.xlu1 %v1613_v7 }
 0x2c1   :  { %v931_v8 = vpop.xlane.xlu1 %930 }
 0x2c2   :  { %v934_v9 = vsub.f32 %v928_v6, %v931_v8 }
 0x2c4   :  { %v936_v10 = vmul.f32 1.442695, %v934_v9 }
 0x2c5   :  { %v933_v11 = vpop.xlane.xlu1 %932 }
 0x2c6   :  { %1365 = vpow2.f32 %v936_v10  ;;  %v935_v12 = vsub.f32 %v1613_v7, %v933_v11 }
 0x2c8   :  { %v938_v13 = vmul.f32 1.442695, %v935_v12 }
 0x2ca   :  { %1367 = vpow2.f32 %v938_v13 }
 0x2d0   :  { %v1366_v14 = vpop.eup %1365 }
 0x2d1   :  { %940 = vadd.xlane.f32.xlu0 %v1366_v14 }
 0x2d4   :  { %v1368_v15 = vpop.eup %1367 }
 0x2d5   :  { %942 = vadd.xlane.f32.xlu1 %v1368_v15 }
 0x2d6   :  { %1450 = shalt.err (!%p1447_p0)
}
 0x2d7   :  { %s1451_s24 = scalar_lea.hbm %s1669_s6, 256 }
 0x2d8   :  { %p1452_p1 = scmp.ne.s32.totalorder %s1669_s6, %s1451_s24  ;;  %p1455_p2 = scmp.lt.u32.totalorder %s1451_s24, %s1669_s6 }
 0x2da   :  { %p1457_p3 = pnand %p1455_p2, %p1452_p1 }
 0x2dc   :  { %1460 = shalt.err (!%p1457_p3)
}
 0x2dd   :  { %s1522_s28 = smov 128   ;;  %s1523_s29 = smov 8  }
 0x2de   :  { %977 = dma.vmem_to_hbm [thread:$0]  %s972_s18, 256, %s1669_s6, [#allocation10], %s1522_s28, %s1522_s28, %s1523_s29  }
 0x2df   :  { %s1461_s9 = scalar_lea.vmem %s960_s20, 256  ;;  %p1466_p5 = scmp.lt.s32.totalorder %s960_s20, %s960_s20 }
 0x2e0   :  { %p1462_p4 = scmp.ne.s32.totalorder %s960_s20, %s1461_s9  ;;  %p1467_p6 = scmp.lt.s32.totalorder %s1461_s9, %s1461_s9 }
 0x2e2   :  { %p1468_p7 = por %p1467_p6, %p1466_p5 }
 0x2e4   :  { %p1469_p8 = pnand %p1468_p7, %p1462_p4 }
 0x2e6   :  { %1472 = shalt.err (!%p1469_p8)
}
 0x2e7   :  { %s1473_s14 = scalar_lea.hbm %s1668_s5, 256 }
 0x2e8   :  { %p1474_p9 = scmp.ne.s32.totalorder %s1668_s5, %s1473_s14  ;;  %p1477_p10 = scmp.lt.u32.totalorder %s1473_s14, %s1668_s5 }
 0x2ea   :  { %p1479_p11 = pnand %p1477_p10, %p1474_p9 }
 0x2ec   :  { %1482 = shalt.err (!%p1479_p11)
}
 0x2ed   :  { %965 = dma.vmem_to_hbm [thread:$0]  %s960_s20, 256, %s1668_s5, [#allocation4], %s1522_s28, %s1522_s28, %s1523_s29  }
 0x2ee   :  { %s1524_s11 = smov [#allocation11]  }
 0x2ef   :  { %s983_s2 = sshll.u32 %s1524_s11, 4  ;;  %s984_s2 = int_to_ptr.vmem [resolvable:$true] %s983_s2 }
 0x2f0   :  { %s1483_s12 = scalar_lea.vmem %s984_s2, 256  ;;  %p1488_p13 = scmp.lt.s32.totalorder %s984_s2, %s984_s2 }
 0x2f1   :  { %p1484_p12 = scmp.ne.s32.totalorder %s984_s2, %s1483_s12  ;;  %p1489_p0 = scmp.lt.s32.totalorder %s1483_s12, %s1483_s12 }
 0x2f3   :  { %p1490_p1 = por %p1489_p0, %p1488_p13 }
 0x2f5   :  { %p1491_p2 = pnand %p1490_p1, %p1484_p12 }
 0x35e   :  { %v941_v16 = vpop.xlane.xlu0 %940 }
 0x35f   :  { %1369 = vlog2.f32 %v941_v16 }
 0x362   :  { %v943_v17 = vpop.xlane.xlu1 %942 }
 0x363   :  { %1371 = vlog2.f32 %v943_v17 }
 0x369   :  { %v1370_v18 = vpop.eup %1369 }
 0x36a   :  { %v945_v19 = vmul.f32 0.6931472, %v1370_v18 }
 0x36c   :  { %v948_v20 = vadd.f32 %v945_v19, %v931_v8 }
 0x36d   :  { %v1372_v21 = vpop.eup %1371 }
 0x36e   :  { %v950_v22 = vsub.f32 %v928_v6, %v948_v20  ;;  %v947_v23 = vmul.f32 0.6931472, %v1372_v21 }
 0x370   :  { %952 = vst [vmem:[#allocation11] sm:$0xff] %v950_v22  ;;  %v949_v24 = vadd.f32 %v947_v23, %v933_v11 }
 0x372   :  { %v951_v25 = vsub.f32 %v1613_v7, %v949_v24 }
 0x374   :  { %953 = vst [vmem:[#allocation11 + $0x8] sm:$0xff] %v951_v25 }
 0x375   :  { %1494 = shalt.err (!%p1491_p2)
}
 0x376   :  { %s1495_s18 = scalar_lea.hbm %s1670_s7, 256 }
 0x377   :  { %p1496_p3 = scmp.ne.s32.totalorder %s1670_s7, %s1495_s18  ;;  %p1499_p4 = scmp.lt.u32.totalorder %s1495_s18, %s1670_s7 }
 0x379   :  { %p1501_p5 = pnand %p1499_p4, %p1496_p3 }
 0x37b   :  { %1504 = shalt.err (!%p1501_p5)
}
 0x37c   :  { %989 = dma.vmem_to_hbm [thread:$0]  %s984_s2, 256, %s1670_s7, [#allocation10], %s1522_s28, %s1522_s28, %s1523_s29  }
 0x37d   :  { %1509 = dma.done.wait [#allocation4], 256  }
 0x37e   :  { %1510 = vsyncadd [#allocation4], 4294967040 }
 0x37f   :  { %1511 = dma.done.wait [#allocation10], 512  }
 0x380   :  { %1512 = vsyncadd [#allocation10], 4294966784 }
 0x381   :  { %999 = vsyncpa [#allocation3], 1 }
 0x382   :  { %1000 = vsyncpa [#allocation6], 1 }
 0x383   :  { %1001 = vsyncpa [#allocation4], 1 }
 0x384   :  { %1002 = vsyncpa [#allocation10], 1 }

</bundles_post_ra>
